<compile_context>
chip_gen: v5e
topology: v5e:2x2
jax: 0.10.0
libtpu: 0.0.40
codegen_flags: <defaults>
</compile_context>

<pallas_src>
import jax
import jax.numpy as jnp
from jax.experimental import pallas as pl
from jax.experimental.pallas import tpu as pltpu


# --------------------------------------------------------------------------
# Kernel
# --------------------------------------------------------------------------
def _regressor_kernel(x_ref, w1_ref, b1_ref, w2_ref, b2_ref, o_ref):
    # Hot path: two MXU matmuls + bias add + ReLU on VMEM-resident tiles.
    h = jnp.dot(x_ref[...], w1_ref[...],
                preferred_element_type=jnp.float32)          # (TB, 128) f32
    h = jnp.maximum(h + b1_ref[...], 0.0)                    # bias + ReLU (f32)
    y = jnp.dot(h, w2_ref[...],
                preferred_element_type=jnp.float32)          # (TB, out_dim)
    o_ref[...] = (y + b2_ref[...]).astype(o_ref.dtype)


# --------------------------------------------------------------------------
# Parameter preparation (hoisted out of the per-call hot path; cache result)
# --------------------------------------------------------------------------
def prepare_params(w1, b1, w2, b2, *, stream_bf16=False):
    """Pad hidden dim 84 -> 128 (exact: zero b1 cols -> relu(0)=0, zero w2 rows).

    Weights stored as (in, out) so the kernel does plain `x @ W` on the MXU.
    If stream_bf16, w1 is stored bf16 (x is cast to bf16 in the wrapper);
    bias/ReLU/second matmul stay f32 via f32 MXU accumulation.
    """
    e_dim, h_dim = w1.shape
    out_dim = w2.shape[1]
    h_pad = ((h_dim + 127) // 128) * 128

    w_dtype = jnp.bfloat16 if stream_bf16 else jnp.float32
    w1p = jnp.zeros((e_dim, h_pad), w_dtype).at[:, :h_dim].set(w1.astype(w_dtype))
    b1p = jnp.zeros((1, h_pad), jnp.float32).at[0, :h_dim].set(b1.astype(jnp.float32))
    w2p = jnp.zeros((h_pad, out_dim), jnp.float32).at[:h_dim, :].set(
        w2.astype(jnp.float32))
    b2p = b2.astype(jnp.float32).reshape(1, out_dim)
    return w1p, b1p, w2p, b2p


# --------------------------------------------------------------------------
# Tiling / scheduling helpers
# --------------------------------------------------------------------------
def _choose_batch_tile(B, block_rows, min_steps=4):
    """Sublane-aligned batch tile: as large as block_rows allows, but keep
    >= min_steps grid steps so double-buffering / megacore sharding stay alive."""
    block_rows = max(8, (block_rows // 8) * 8)
    if B < 8:
        return B                      # block == full array dim (no 8-row pad needed)
    tb = max(8, -(-B // min_steps))   # ceil(B / min_steps)
    tb = ((tb + 7) // 8) * 8          # sublane align
    return min(block_rows, tb)


def _dimension_semantics(grid_b):
    """CORE_PARALLEL actually splits the batch grid across v7x's 2 TensorCores;
    on single-TC chips (v5e/v6e) plain "parallel" is equivalent."""
    kind = ""
    try:
        kind = jax.devices()[0].device_kind.lower()
    except Exception:
        pass
    if grid_b >= 2 and ("v7" in kind or "7x" in kind) and hasattr(pltpu, "CORE_PARALLEL"):
        return (pltpu.CORE_PARALLEL,)
    return ("parallel",)


# --------------------------------------------------------------------------
# Forward wrapper
# --------------------------------------------------------------------------
def regressor_forward(x, params, *, block_rows=4096):
    """x: (B, e_dim) f32.  params: output of prepare_params()."""
    w1p, b1p, w2p, b2p = params
    B, e_dim = x.shape
    h_pad = w1p.shape[1]
    out_dim = w2p.shape[1]
    out_dtype = x.dtype

    stream_bf16 = (w1p.dtype == jnp.bfloat16)
    # NOTE: this cast only pays off if upstream already keeps x in bf16;
    # otherwise it is an extra HBM pass. Default path keeps x in f32.
    x_in = x.astype(jnp.bfloat16) if stream_bf16 else x

    tb = _choose_batch_tile(B, block_rows)
    grid_b = pl.cdiv(B, tb)           # ragged last block handled by Pallas
                                      # (masked writeback; no wrapper-side pad copy)

    itemsize = lambda a: jnp.dtype(a.dtype).itemsize
    cost = pl.CostEstimate(
        flops=2 * B * (e_dim * h_pad + h_pad * out_dim),
        bytes_accessed=(itemsize(x_in) * B * e_dim             # x stream
                        + itemsize(w1p) * e_dim * h_pad        # w1 (resident)
                        + 4 * (h_pad + h_pad * out_dim + out_dim)  # b1, w2, b2
                        + jnp.dtype(out_dtype).itemsize * B * out_dim),  # writeback
        transcendentals=0,
    )

    return pl.pallas_call(
        _regressor_kernel,
        out_shape=jax.ShapeDtypeStruct((B, out_dim), out_dtype),
        grid=(grid_b,),
        in_specs=[
            # Batch-tiled activation stream (double-buffered by Pallas).
            pl.BlockSpec((tb, e_dim), lambda i: (i, 0)),
            # Weights / biases: constant index_map -> VMEM-resident across steps.
            pl.BlockSpec((e_dim, h_pad), lambda i: (0, 0)),
            pl.BlockSpec((1, h_pad), lambda i: (0, 0)),
            pl.BlockSpec((h_pad, out_dim), lambda i: (0, 0)),
            pl.BlockSpec((1, out_dim), lambda i: (0, 0)),
        ],
        out_specs=pl.BlockSpec((tb, out_dim), lambda i: (i, 0)),
        compiler_params=pltpu.CompilerParams(
            dimension_semantics=_dimension_semantics(grid_b),
        ),
        cost_estimate=cost,
    )(x_in, w1p, b1p, w2p, b2p)


# --------------------------------------------------------------------------
# Param init mimicking PyTorch nn.Linear default (uniform +/- 1/sqrt(fan_in))
# --------------------------------------------------------------------------
def init_params(key, e_dim=16 * 4 * 4, hidden=84, output_dim=3):
    k1, k2, k3, k4 = jax.random.split(key, 4)
    bound1 = 1.0 / (e_dim ** 0.5)
    bound2 = 1.0 / (hidden ** 0.5)
    w1 = jax.random.uniform(k1, (e_dim, hidden), jnp.float32, -bound1, bound1)
    b1 = jax.random.uniform(k2, (hidden,), jnp.float32, -bound1, bound1)
    w2 = jax.random.uniform(k3, (hidden, output_dim), jnp.float32, -bound2, bound2)
    b2 = jax.random.uniform(k4, (output_dim,), jnp.float32, -bound2, bound2)
    return w1, b1, w2, b2


if __name__ == "__main__":
    key = jax.random.PRNGKey(0)
    k_x, k_x2, k_p = jax.random.split(key, 3)

    E_DIM = 16 * 4 * 4  # 256, module default
    w1, b1, w2, b2 = init_params(k_p, e_dim=E_DIM, hidden=84, output_dim=3)
    params = prepare_params(w1, b1, w2, b2)          # padded once, reused

    # --- aligned batch --------------------------------------------------
    B = 8
    x = jax.random.normal(k_x, (B, E_DIM), jnp.float32)
    out = jax.block_until_ready(regressor_forward(x, params))
    ref = jnp.maximum(x @ w1 + b1, 0.0) @ w2 + b2
    assert out.shape == (B, 3)
    assert jnp.allclose(out, ref, atol=1e-4, rtol=1e-4)

    # --- ragged batch (exercises masked last-tile writeback, no pad copy) -
    B2 = 12
    x2 = jax.random.normal(k_x2, (B2, E_DIM), jnp.float32)
    out2 = jax.block_until_ready(regressor_forward(x2, params))
    ref2 = jnp.maximum(x2 @ w1 + b1, 0.0) @ w2 + b2
    assert out2.shape == (B2, 3)
    assert jnp.allclose(out2, ref2, atol=1e-4, rtol=1e-4)

    print("KERNEL_OK")
</pallas_src>

<mosaic_0001>
module attributes {stable_mosaic.version = 11 : i64} {
  func.func @_regressor_kernel(%arg0: i32, %arg1: memref<8x256xf32, #tpu.memory_space<vmem>>, %arg2: memref<256x128xf32, #tpu.memory_space<vmem>>, %arg3: memref<1x128xf32, #tpu.memory_space<vmem>>, %arg4: memref<128x3xf32, #tpu.memory_space<vmem>>, %arg5: memref<1x3xf32, #tpu.memory_space<vmem>>, %arg6: memref<8x3xf32, #tpu.memory_space<vmem>>) attributes {dimension_semantics = [#tpu.dimension_semantics<parallel>], iteration_bounds = array<i64: 1>, scalar_prefetch = 0 : i64, scratch_operands = 0 : i64, tpu.core_type = #tpu.core_type<tc>, window_params = [{transform_indices = @transform_0, window_bounds = array<i64: 8, 256>}, {pipeline_mode = #tpu.pipeline_mode<synchronous>, transform_indices = @transform_1, window_bounds = array<i64: 256, 128>}, {pipeline_mode = #tpu.pipeline_mode<synchronous>, transform_indices = @transform_2, window_bounds = array<i64: 1, 128>}, {pipeline_mode = #tpu.pipeline_mode<synchronous>, transform_indices = @transform_3, window_bounds = array<i64: 128, 3>}, {pipeline_mode = #tpu.pipeline_mode<synchronous>, transform_indices = @transform_4, window_bounds = array<i64: 1, 3>}, {transform_indices = @transform_5, window_bounds = array<i64: 8, 3>}]} {
    %c0 = arith.constant 0 : index
    %c0_0 = arith.constant 0 : index
    %0 = vector.load %arg1[%c0, %c0_0] : memref<8x256xf32, #tpu.memory_space<vmem>>, vector<8x256xf32>
    %c0_1 = arith.constant 0 : index
    %c0_2 = arith.constant 0 : index
    %1 = vector.load %arg2[%c0_1, %c0_2] : memref<256x128xf32, #tpu.memory_space<vmem>>, vector<256x128xf32>
    %cst = arith.constant dense<0.000000e+00> : vector<8x128xf32>
    %2 = tpu.matmul %0, %1, %cst {dimension_numbers = #tpu.dot_dimension_numbers<[1], [0], [0], [1], [0, 0, 1, 1], [], []>} : vector<8x256xf32>, vector<256x128xf32>, vector<8x128xf32> -> vector<8x128xf32>
    %c0_3 = arith.constant 0 : index
    %c0_4 = arith.constant 0 : index
    %3 = vector.load %arg3[%c0_3, %c0_4] : memref<1x128xf32, #tpu.memory_space<vmem>>, vector<1x128xf32>
    %4 = vector.broadcast %3 : vector<1x128xf32> to vector<8x128xf32>
    %5 = arith.addf %2, %4 : vector<8x128xf32>
    %cst_5 = arith.constant 0.000000e+00 : f32
    %6 = vector.broadcast %cst_5 : f32 to vector<8x128xf32>
    %7 = arith.maximumf %5, %6 : vector<8x128xf32>
    %c0_6 = arith.constant 0 : index
    %c0_7 = arith.constant 0 : index
    %8 = vector.load %arg4[%c0_6, %c0_7] : memref<128x3xf32, #tpu.memory_space<vmem>>, vector<128x3xf32>
    %cst_8 = arith.constant dense<0.000000e+00> : vector<8x3xf32>
    %9 = tpu.matmul %7, %8, %cst_8 {dimension_numbers = #tpu.dot_dimension_numbers<[1], [0], [0], [1], [0, 0, 1, 1], [], []>} : vector<8x128xf32>, vector<128x3xf32>, vector<8x3xf32> -> vector<8x3xf32>
    %c0_9 = arith.constant 0 : index
    %c0_10 = arith.constant 0 : index
    %10 = vector.load %arg5[%c0_9, %c0_10] : memref<1x3xf32, #tpu.memory_space<vmem>>, vector<1x3xf32>
    %11 = vector.broadcast %10 : vector<1x3xf32> to vector<8x3xf32>
    %12 = arith.addf %9, %11 : vector<8x3xf32>
    %c0_11 = arith.constant 0 : index
    %c0_12 = arith.constant 0 : index
    %13 = vector.load %arg6[%c0_11, %c0_12] : memref<8x3xf32, #tpu.memory_space<vmem>>, vector<8x3xf32>
    tpu.vector_store %arg6[%c0_11, %c0_12], %12 {strides = array<i32>} : memref<8x3xf32, #tpu.memory_space<vmem>>, vector<8x3xf32>,
    return
  }
  func.func @transform_0(%arg0: i32) -> (i32, i32) {
    %c0_i32 = arith.constant 0 : i32
    %c0_i32_0 = arith.constant 0 : i32
    return %arg0, %c0_i32 : i32, i32
  }
  func.func @transform_1(%arg0: i32) -> (i32, i32) {
    %c0_i32 = arith.constant 0 : i32
    %c0_i32_0 = arith.constant 0 : i32
    %c0_i32_1 = arith.constant 0 : i32
    return %c0_i32, %c0_i32_0 : i32, i32
  }
  func.func @transform_2(%arg0: i32) -> (i32, i32) {
    %c0_i32 = arith.constant 0 : i32
    %c0_i32_0 = arith.constant 0 : i32
    %c0_i32_1 = arith.constant 0 : i32
    return %c0_i32, %c0_i32_0 : i32, i32
  }
  func.func @transform_3(%arg0: i32) -> (i32, i32) {
    %c0_i32 = arith.constant 0 : i32
    %c0_i32_0 = arith.constant 0 : i32
    %c0_i32_1 = arith.constant 0 : i32
    return %c0_i32, %c0_i32_0 : i32, i32
  }
  func.func @transform_4(%arg0: i32) -> (i32, i32) {
    %c0_i32 = arith.constant 0 : i32
    %c0_i32_0 = arith.constant 0 : i32
    %c0_i32_1 = arith.constant 0 : i32
    return %c0_i32, %c0_i32_0 : i32, i32
  }
  func.func @transform_5(%arg0: i32) -> (i32, i32) {
    %c0_i32 = arith.constant 0 : i32
    %c0_i32_0 = arith.constant 0 : i32
    return %arg0, %c0_i32 : i32, i32
  }
}

</mosaic_0001>

<bundles_post_ra>
// kernel: tpu_custom_call.1
= control target key start
LH: loop header
LB: loop body
LE: loop exit
PB: predicated region body
PF: predicated region fallthrough
CT: control target
= control target key end

     0   :  { %10 = vsyncpa [#allocation3], 0  ;;  %s193_s21 = smov [#allocation2]   ;;  %s194_s23 = smov 128   ;;  %s292_s0 = inlined_call_operand.vmem [shape: f32[8,256], index: 0, kind: input, shape index: {}]   ;;  %s293_s1 = inlined_call_operand.hbm [shape: f32[256,128], index: 1, kind: input, shape index: {}]   ;;  %s294_s2 = inlined_call_operand.vmem [shape: f32[1,128], index: 2, kind: input, shape index: {}]   ;;  %s295_s3 = inlined_call_operand.vmem [shape: f32[128,3], index: 3, kind: input, shape index: {}]   ;;  %s296_s4 = inlined_call_operand.vmem [shape: f32[1,3], index: 4, kind: input, shape index: {}]   ;;  %s297_s5 = inlined_call_operand.vmem [shape: f32[8,3], index: 5, kind: output, shape index: {}]  }
   0x1   :  { %s17_s20 = sshll.u32 %s293_s1, 4  ;;  %s19_s22 = sshll.u32 %s193_s21, 4  ;;  %s18_s20 = int_to_ptr.hbm [resolvable:$true] %s17_s20  ;;  %s20_s22 = int_to_ptr.vmem [resolvable:$true] %s19_s22 }
   0x2   :  { %s195_s24 = smov 8  }
   0x3   :  { %25 = dma.hbm_to_vmem [thread:$0]  %s18_s20, 4096, %s20_s22, [#allocation3], %s194_s23, %s194_s23, %s195_s24  }
   0x4   :  { %191 = dma.done.wait [#allocation3], 4096  }
   0x5   :  { %192 = vsyncadd [#allocation3], 4294963200  ;;  %v53_v0 = vld [vmem:[#allocation2 + $0x78] sm:$0xff]  ;;  %v52_v1 = vld [vmem:[#allocation2 + $0x70] sm:$0xff]  ;;  %vm155_vm0 = vcmask 23552  }
   0x6   :  { %v69_v2 = vld [vmem:[#allocation2 + $0xf8] sm:$0xff]  ;;  %74 = vmatpush.msra.mxu0 %v53_v0  ;;  %v68_v3 = vld [vmem:[#allocation2 + $0xf0] sm:$0xff]  ;;  %v51_v4 = vld [vmem:[#allocation2 + $0x68] sm:$0xff] }
   0x7   :  { %94 = vmatpush.msra.mxu1 %v69_v2  ;;  %v67_v5 = vld [vmem:[#allocation2 + $0xe8] sm:$0xff]  ;;  %v50_v6 = vld [vmem:[#allocation2 + $0x60] sm:$0xff]  ;;  %v49_v8 = vld [vmem:[#allocation2 + $0x58] sm:$0xff] }
   0x8   :  { %75 = vmatpush.msra.mxu0 %v52_v1  ;;  %v66_v7 = vld [vmem:[#allocation2 + $0xe0] sm:$0xff]  ;;  %v65_v9 = vld [vmem:[#allocation2 + $0xd8] sm:$0xff]  ;;  %v48_v10 = vld [vmem:[#allocation2 + $0x50] sm:$0xff] }
   0x9   :  { %95 = vmatpush.msra.mxu1 %v68_v3  ;;  %v64_v11 = vld [vmem:[#allocation2 + $0xd0] sm:$0xff]  ;;  %v47_v12 = vld [vmem:[#allocation2 + $0x48] sm:$0xff]  ;;  %v130_v14 = vld [vmem:[%s295_s3 + $0x78] sm:$0xff] }
   0xa   :  { %76 = vmatpush.msra.mxu0 %v51_v4  ;;  %v63_v13 = vld [vmem:[#allocation2 + $0xc8] sm:$0xff]  ;;  %v129_v15 = vld [vmem:[%s295_s3 + $0x70] sm:$0xff]  ;;  %v46_v16 = vld [vmem:[#allocation2 + $0x40] sm:$0xff]  ;;  %135 = vmatpush.msra.mxu2 %v130_v14 }
   0xb   :  { %96 = vmatpush.msra.mxu1 %v67_v5  ;;  %v62_v17 = vld [vmem:[#allocation2 + $0xc0] sm:$0xff]  ;;  %v128_v18 = vld [vmem:[%s295_s3 + $0x68] sm:$0xff]  ;;  %v45_v19 = vld [vmem:[#allocation2 + $0x38] sm:$0xff] }
   0xc   :  { %77 = vmatpush.msra.mxu0 %v50_v6  ;;  %v61_v20 = vld [vmem:[#allocation2 + $0xb8] sm:$0xff]  ;;  %136 = vmatpush.msra.mxu2 %v129_v15  ;;  %v127_v21 = vld [vmem:[%s295_s3 + $0x60] sm:$0xff]  ;;  %v44_v22 = vld [vmem:[#allocation2 + $0x30] sm:$0xff] }
   0xd   :  { %97 = vmatpush.msra.mxu1 %v66_v7  ;;  %v60_v23 = vld [vmem:[#allocation2 + $0xb0] sm:$0xff]  ;;  %v126_v24 = vld [vmem:[%s295_s3 + $0x58] sm:$0xff]  ;;  %v43_v25 = vld [vmem:[#allocation2 + $0x28] sm:$0xff] }
   0xe   :  { %78 = vmatpush.msra.mxu0 %v49_v8  ;;  %137 = vmatpush.msra.mxu2 %v128_v18  ;;  %v59_v26 = vld [vmem:[#allocation2 + $0xa8] sm:$0xff]  ;;  %v125_v27 = vld [vmem:[%s295_s3 + $0x50] sm:$0xff]  ;;  %v42_v28 = vld [vmem:[#allocation2 + $0x20] sm:$0xff] }
   0xf   :  { %98 = vmatpush.msra.mxu1 %v65_v9  ;;  %v58_v29 = vld [vmem:[#allocation2 + $0xa0] sm:$0xff]  ;;  %v124_v30 = vld [vmem:[%s295_s3 + $0x48] sm:$0xff]  ;;  %v41_v31 = vld [vmem:[#allocation2 + $0x18] sm:$0xff] }
  0x10   :  { %79 = vmatpush.msra.mxu0 %v48_v10  ;;  %138 = vmatpush.msra.mxu2 %v127_v21  ;;  %v57_v32 = vld [vmem:[#allocation2 + $0x98] sm:$0xff]  ;;  %v123_v33 = vld [vmem:[%s295_s3 + $0x40] sm:$0xff]  ;;  %v40_v34 = vld [vmem:[#allocation2 + $0x10] sm:$0xff] }
  0x11   :  { %99 = vmatpush.msra.mxu1 %v64_v11  ;;  %v56_v35 = vld [vmem:[#allocation2 + $0x90] sm:$0xff]  ;;  %v122_v36 = vld [vmem:[%s295_s3 + $0x38] sm:$0xff]  ;;  %v39_v37 = vld [vmem:[#allocation2 + $0x8] sm:$0xff] }
  0x12   :  { %80 = vmatpush.msra.mxu0 %v47_v12  ;;  %139 = vmatpush.msra.mxu2 %v126_v24  ;;  %v55_v38 = vld [vmem:[#allocation2 + $0x88] sm:$0xff]  ;;  %v121_v39 = vld [vmem:[%s295_s3 + $0x30] sm:$0xff]  ;;  %v38_v40 = vld [vmem:[#allocation2] sm:$0xff] }
  0x13   :  { %100 = vmatpush.msra.mxu1 %v63_v13  ;;  %v54_v41 = vld [vmem:[#allocation2 + $0x80] sm:$0xff]  ;;  %v37_v43 = vld [vmem:[%s292_s0 + $0x8] sm:$0xff]  ;;  %v118_v46 = vld [vmem:[%s295_s3 + $0x18] sm:$0xff] }
  0x14   :  { %81 = vmatpush.msra.mxu0 %v46_v16  ;;  %140 = vmatpush.msra.mxu2 %v125_v27  ;;  %v36_v42 = vld [vmem:[%s292_s0] sm:$0xff]  ;;  %v120_v44 = vld [vmem:[%s295_s3 + $0x28] sm:$0xff]  ;;  %v117_v47 = vld [vmem:[%s295_s3 + $0x10] sm:$0xff] }
  0x15   :  { %101 = vmatpush.msra.mxu1 %v62_v17  ;;  %v119_v45 = vld [vmem:[%s295_s3 + $0x20] sm:$0xff]  ;;  %v116_v48 = vld [vmem:[%s295_s3 + $0x8] sm:$0xff] }
  0x16   :  { %82 = vmatpush.msra.mxu0 %v45_v19  ;;  %141 = vmatpush.msra.mxu2 %v124_v30  ;;  %v115_v49 = vld [vmem:[%s295_s3] sm:$0xff] }
  0x17   :  { %102 = vmatpush.msra.mxu1 %v61_v20  ;;  %v165_v50 = vld [vmem:[%s294_s2] ss:$0 sm:$0xff] }
  0x18   :  { %83 = vmatpush.msra.mxu0 %v44_v22  ;;  %142 = vmatpush.msra.mxu2 %v123_v33  ;;  %v166_v56 = vld [vmem:[%s296_s4] ss:$0 sm:$0xff] }
  0x19   :  { %103 = vmatpush.msra.mxu1 %v60_v23 }
  0x1a   :  { %84 = vmatpush.msra.mxu0 %v43_v25  ;;  %143 = vmatpush.msra.mxu2 %v122_v36 }
  0x1b   :  { %104 = vmatpush.msra.mxu1 %v59_v26 }
  0x1c   :  { %85 = vmatpush.msra.mxu0 %v42_v28  ;;  %144 = vmatpush.msra.mxu2 %v121_v39 }
  0x1d   :  { %105 = vmatpush.msra.mxu1 %v58_v29 }
  0x1e   :  { %86 = vmatpush.msra.mxu0 %v41_v31  ;;  %145 = vmatpush.msra.mxu2 %v120_v44 }
  0x1f   :  { %106 = vmatpush.msra.mxu1 %v57_v32 }
  0x20   :  { %87 = vmatpush.msra.mxu0 %v40_v34  ;;  %146 = vmatpush.msra.mxu2 %v119_v45 }
  0x21   :  { %107 = vmatpush.msra.mxu1 %v56_v35 }
  0x22   :  { %88 = vmatpush.msra.mxu0 %v39_v37  ;;  %147 = vmatpush.msra.mxu2 %v118_v46 }
  0x23   :  { %108 = vmatpush.msra.mxu1 %v55_v38 }
  0x24   :  { %89 = vmatpush.msra.mxu0 %v38_v40  ;;  %148 = vmatpush.msra.mxu2 %v117_v47 }
  0x25   :  { %109 = vmatpush.msra.mxu1 %v54_v41  ;;  %90 = vmatmul.f32.vlgmr.msra.gmra.mxu0 %v36_v42 }
  0x26   :  { %110 = vmatmul.f32.vlgmr.msra.gmra.mxu1 %v37_v43  ;;  %149 = vmatpush.msra.mxu2 %v116_v48 }
  0x28   :  { %150 = vmatpush.msra.mxu2 %v115_v49 }
  0xa2   :  { %v91_v51 = vpop.f32.mrf.mxu0 }
  0xa3   :  { %v111_v52 = vpop.f32.mrf.mxu1  ;;  %v92_v53 = vadd.f32 %v165_v50, %v91_v51 }
  0xa5   :  { %v112_v54 = vadd.f32 %v111_v52, %v92_v53 }
  0xa7   :  { %v114_v55 = vmax.f32 %v112_v54, 0.0 }
  0xa9   :  { %151 = vmatmul.f32.vlgmr.msra.gmra.mxu2 %v114_v55 }
 0x12c   :  { %v152_v57 = vpop.f32.mrf.mxu2 }
 0x12d   :  { %v153_v58 = vadd.f32 %v166_v56, %v152_v57 }
 0x12f   :  { %156 = vst.msk [vmem:[%s297_s5] sm:$0xff] %vm155_vm0, %v153_v58 }
 0x130   :  { %161 = vsyncpa [#allocation3], 1 }

</bundles_post_ra>
